<compile_context>
chip_gen: v7x
topology: tpu7x:2x2x1
jax: 0.10.0
libtpu: 0.0.40
codegen_flags: <defaults>
</compile_context>

<pallas_src>
import functools

import jax
import jax.numpy as jnp
from jax.experimental import pallas as pl
from jax.experimental.pallas import tpu as pltpu


_VMEM_LIMIT_BYTES = 48 << 20      # <= v7x's 64 MiB physical VMEM, with headroom
_FUSED_STACK_BUDGET = 20 << 20    # conservative gate for the single-launch small-graph path


def _round_up(x, m):
    return ((x + m - 1) // m) * m


def _pick_tiles(num_nodes):
    """Dest-node tile up to 512; keep >= 2 i-steps when possible (v7x dual TC)."""
    n128 = _round_up(max(num_nodes, 1), 128)
    tile_n = 128
    for cand in (512, 256, 128):
        if cand <= n128 and (n128 // cand >= 2 or cand == n128):
            tile_n = cand
            break
    tile_k = min(256, tile_n)  # 256 matches v6e/v7x MXU depth; divides tile_n
    return tile_n, tile_k


# ----------------------------------------------------------------------------
# Kernel A: one fused GCN layer   out = relu((A @ X) @ W + b)
#   grid = (dest-node tiles, source-node tiles); f32 VMEM accumulator for A@X,
#   W resident in VMEM, bias + W-matmul + ReLU in the last-k epilogue.
# ----------------------------------------------------------------------------
def _gcn_layer_kernel(a_ref, x_ref, w_ref, b_ref, o_ref, acc_ref):
    k = pl.program_id(1)

    @pl.when(k == 0)
    def _():
        acc_ref[...] = jnp.zeros_like(acc_ref)

    # bf16 x bf16 -> f32 accumulate on the MXU.
    acc_ref[...] += jnp.dot(a_ref[...], x_ref[...],
                            preferred_element_type=jnp.float32)

    @pl.when(k == pl.num_programs(1) - 1)
    def _():
        hw = jnp.dot(acc_ref[...].astype(jnp.bfloat16), w_ref[...],
                     preferred_element_type=jnp.float32)
        o_ref[...] = jnp.maximum(hw + b_ref[...], 0.0).astype(o_ref.dtype)


def gcn_layer_tiled(a_pad, x_pad, w_pad, b_pad, *, tile_n, tile_k, out_dtype):
    """One GCNConv layer + ReLU on padded, lane-dense operands.

    a_pad : (Np, Np) bf16 normalized adjacency (zero-padded)
    x_pad : (Np, Fi) bf16 node features (Fi multiple of 128)
    w_pad : (Fi, Fo) bf16 weights (Fo multiple of 128)
    b_pad : (1, Fo)  f32 bias
    """
    n_pad = a_pad.shape[0]
    f_in = x_pad.shape[1]
    f_out = w_pad.shape[1]
    assert n_pad % tile_n == 0 and n_pad % tile_k == 0

    # Explicit VMEM budget (double-buffered inputs/outputs + f32 accumulator scratch).
    out_bytes = jnp.dtype(out_dtype).itemsize
    vmem_est = (2 * tile_n * tile_k * 2        # A tiles (bf16)
                + 2 * tile_k * f_in * 2        # X tiles (bf16)
                + 2 * f_in * f_out * 2         # W resident (still buffered)
                + 2 * f_out * 4                # bias
                + 2 * tile_n * f_out * out_bytes
                + tile_n * f_in * 4)           # accumulator scratch
    assert vmem_est <= _VMEM_LIMIT_BYTES, vmem_est

    return pl.pallas_call(
        _gcn_layer_kernel,
        out_shape=jax.ShapeDtypeStruct((n_pad, f_out), out_dtype),
        grid_spec=pltpu.PrefetchScalarGridSpec(
            num_scalar_prefetch=0,
            grid=(n_pad // tile_n, n_pad // tile_k),
            in_specs=[
                pl.BlockSpec((tile_n, tile_k), lambda i, k: (i, k)),   # A_hat tile
                pl.BlockSpec((tile_k, f_in), lambda i, k: (k, 0)),     # X source tile
                pl.BlockSpec((f_in, f_out), lambda i, k: (0, 0)),      # W (resident)
                pl.BlockSpec((1, f_out), lambda i, k: (0, 0)),         # bias
            ],
            out_specs=pl.BlockSpec((tile_n, f_out), lambda i, k: (i, 0)),
            scratch_shapes=[pltpu.VMEM((tile_n, f_in), jnp.float32)],
        ),
        compiler_params=pltpu.CompilerParams(
            dimension_semantics=("parallel", "arbitrary"),
            vmem_limit_bytes=_VMEM_LIMIT_BYTES),
    )(a_pad, x_pad, w_pad, b_pad)


# ----------------------------------------------------------------------------
# Kernel B: whole-stack fusion for small graphs (everything VMEM-resident,
# single launch, layer loop unrolled inside the kernel).
# ----------------------------------------------------------------------------
def _gcn_stack_kernel(a_ref, x_ref, w_ref, b_ref, o_ref, *, num_layers):
    a = a_ref[...]          # (Np, Np)  bf16
    h = x_ref[...]          # (Np, Fm)  bf16
    act = None
    for l in range(num_layers):
        ax = jnp.dot(a, h, preferred_element_type=jnp.float32)
        hw = jnp.dot(ax.astype(jnp.bfloat16), w_ref[l],
                     preferred_element_type=jnp.float32)
        act = jnp.maximum(hw + b_ref[l], 0.0)
        h = act.astype(jnp.bfloat16)   # hidden activations in bf16
        # TODO(synk): F.dropout between hidden layers is identity in eval mode;
        # training-mode dropout would use pltpu.prng_seed / prng_random_bits.
    o_ref[...] = act.astype(o_ref.dtype)


def _fused_stack_fits(num_nodes, dims_pad, num_layers):
    n_pad = _round_up(num_nodes, 128)
    f_max = max(dims_pad)
    est = (n_pad * n_pad * 2                    # A bf16
           + n_pad * f_max * 2                  # X bf16
           + num_layers * f_max * f_max * 2     # stacked W bf16
           + num_layers * f_max * 4             # stacked bias
           + n_pad * f_max * 4                  # output f32
           + 4 * n_pad * f_max * 4)             # in-kernel temporaries
    return est <= _FUSED_STACK_BUDGET


def _forward_fused_stack(params, x, a_hat, num_nodes, num_classes, dims_pad):
    num_layers = len(params)
    n_pad = _round_up(num_nodes, 128)
    f_max = max(dims_pad)

    a_pad = jnp.zeros((n_pad, n_pad), jnp.bfloat16)
    a_pad = a_pad.at[:num_nodes, :num_nodes].set(a_hat.astype(jnp.bfloat16))
    x_pad = jnp.zeros((n_pad, f_max), jnp.bfloat16)
    x_pad = x_pad.at[:num_nodes, :x.shape[1]].set(x.astype(jnp.bfloat16))

    w_stack = jnp.zeros((num_layers, f_max, f_max), jnp.bfloat16)
    b_stack = jnp.zeros((num_layers, 1, f_max), jnp.float32)
    for li, (w, b) in enumerate(params):
        w_stack = w_stack.at[li, :w.shape[0], :w.shape[1]].set(w.astype(jnp.bfloat16))
        b_stack = b_stack.at[li, 0, :b.shape[0]].set(b)

    out = pl.pallas_call(
        functools.partial(_gcn_stack_kernel, num_layers=num_layers),
        out_shape=jax.ShapeDtypeStruct((n_pad, f_max), jnp.float32),
        grid_spec=pltpu.PrefetchScalarGridSpec(
            num_scalar_prefetch=0,
            grid=(1,),
            in_specs=[
                pl.BlockSpec((n_pad, n_pad), lambda i: (0, 0)),
                pl.BlockSpec((n_pad, f_max), lambda i: (0, 0)),
                pl.BlockSpec((num_layers, f_max, f_max), lambda i: (0, 0, 0)),
                pl.BlockSpec((num_layers, 1, f_max), lambda i: (0, 0, 0)),
            ],
            out_specs=pl.BlockSpec((n_pad, f_max), lambda i: (0, 0)),
        ),
        compiler_params=pltpu.CompilerParams(
            dimension_semantics=("arbitrary",),
            vmem_limit_bytes=_VMEM_LIMIT_BYTES),
    )(a_pad, x_pad, w_stack, b_stack)
    return out[:num_nodes, :num_classes]


def _forward_tiled(params, x, a_hat, num_nodes, num_classes, dims_pad):
    num_layers = len(params)
    tile_n, tile_k = _pick_tiles(num_nodes)
    n_pad = _round_up(num_nodes, tile_n)

    a_pad = jnp.zeros((n_pad, n_pad), jnp.bfloat16)
    a_pad = a_pad.at[:num_nodes, :num_nodes].set(a_hat.astype(jnp.bfloat16))

    h = jnp.zeros((n_pad, dims_pad[0]), jnp.bfloat16)
    h = h.at[:num_nodes, :x.shape[1]].set(x.astype(jnp.bfloat16))

    for li, (w, b) in enumerate(params):
        fi, fo = w.shape
        fi_pad, fo_pad = dims_pad[li], dims_pad[li + 1]
        assert fi_pad == h.shape[1]
        w_pad = jnp.zeros((fi_pad, fo_pad), jnp.bfloat16).at[:fi, :fo].set(
            w.astype(jnp.bfloat16))
        b_pad = jnp.zeros((1, fo_pad), jnp.float32).at[0, :fo].set(b)
        out_dtype = jnp.float32 if li == num_layers - 1 else jnp.bfloat16
        h = gcn_layer_tiled(a_pad, h, w_pad, b_pad,
                            tile_n=tile_n, tile_k=tile_k, out_dtype=out_dtype)
    return h[:num_nodes, :num_classes]


# ----------------------------------------------------------------------------
# Glue: dense normalized adjacency from edge_index (GCNConv normalization)
# ----------------------------------------------------------------------------
def build_normalized_adjacency(edge_index, num_nodes):
    """A_hat = D^{-1/2} (A + I) D^{-1/2}, matching GCNConv(add_self_loops=True)."""
    src = edge_index[0]
    dst = edge_index[1]
    loop = jnp.arange(num_nodes, dtype=edge_index.dtype)
    src = jnp.concatenate([src, loop])
    dst = jnp.concatenate([dst, loop])
    a = jnp.zeros((num_nodes, num_nodes), dtype=jnp.float32)
    a = a.at[dst, src].add(1.0)  # duplicate edges accumulate, as in dense PyG conversion
    deg = jnp.sum(a, axis=1)
    deg_inv_sqrt = jnp.where(deg > 0, 1.0 / jnp.sqrt(deg), 0.0)
    return deg_inv_sqrt[:, None] * a * deg_inv_sqrt[None, :]


# ----------------------------------------------------------------------------
# Params: num_layers GCNConv layers (hidden..., num_classes)
# ----------------------------------------------------------------------------
def init_gcn_params(key, in_features, hidden_size, num_classes, num_layers=2):
    dims = [in_features] + [hidden_size] * (num_layers - 1) + [num_classes]
    params = []
    for li in range(num_layers):
        key, kw = jax.random.split(key)
        f_in, f_out = dims[li], dims[li + 1]
        scale = jnp.sqrt(6.0 / (f_in + f_out))  # glorot weight, zero bias (GCNConv default)
        w = jax.random.uniform(kw, (f_in, f_out), jnp.float32, -scale, scale)
        b = jnp.zeros((f_out,), jnp.float32)
        params.append((w, b))
    return params


@functools.partial(jax.jit, static_argnames=("num_nodes", "mode"))
def gcn_forward(params, x, edge_index, *, num_nodes, mode="auto"):
    num_classes = params[-1][0].shape[1]
    dims_pad = [_round_up(x.shape[1], 128)] + [_round_up(w.shape[1], 128)
                                               for w, _ in params]
    a_hat = build_normalized_adjacency(edge_index, num_nodes)

    if mode == "auto":
        mode = "fused" if _fused_stack_fits(num_nodes, dims_pad, len(params)) else "tiled"

    if mode == "fused":
        return _forward_fused_stack(params, x, a_hat, num_nodes, num_classes, dims_pad)
    return _forward_tiled(params, x, a_hat, num_nodes, num_classes, dims_pad)


# ----------------------------------------------------------------------------
# References for sanity checking
# ----------------------------------------------------------------------------
def gcn_forward_ref(params, x, edge_index, num_nodes):
    """Pure-f32 reference."""
    a_hat = build_normalized_adjacency(edge_index, num_nodes)
    h = x
    for w, b in params:
        h = jnp.maximum(a_hat @ (h @ w) + b[None, :], 0.0)
    return h


def gcn_forward_matched_ref(params, x, edge_index, num_nodes):
    """Reference with the same dtype flow as the kernels (bf16 A/X/W/AX, f32 acc)."""
    hi = jax.lax.Precision.HIGHEST
    a_hat = build_normalized_adjacency(edge_index, num_nodes)
    a_hat = a_hat.astype(jnp.bfloat16).astype(jnp.float32)
    h = x.astype(jnp.bfloat16).astype(jnp.float32)
    for li, (w, b) in enumerate(params):
        ax = jnp.dot(a_hat, h, precision=hi)
        ax = ax.astype(jnp.bfloat16).astype(jnp.float32)
        wb = w.astype(jnp.bfloat16).astype(jnp.float32)
        h = jnp.maximum(jnp.dot(ax, wb, precision=hi) + b[None, :], 0.0)
        if li < len(params) - 1:
            h = h.astype(jnp.bfloat16).astype(jnp.float32)
    return h


if __name__ == "__main__":
    # ---- Test 1: small graph -> single-launch fused-stack kernel (auto path) ----
    key = jax.random.PRNGKey(0)
    num_nodes = 128
    in_features = 16
    hidden_size = 32
    num_classes = 8
    num_layers = 2
    num_edges = 256

    k_x, k_e, k_p = jax.random.split(key, 3)
    x = jax.random.normal(k_x, (num_nodes, in_features), jnp.float32)
    edge_index = jax.random.randint(k_e, (2, num_edges), 0, num_nodes, jnp.int32)
    params = init_gcn_params(k_p, in_features, hidden_size, num_classes, num_layers)

    out = gcn_forward(params, x, edge_index, num_nodes=num_nodes, mode="auto")
    out = jax.block_until_ready(out)
    assert out.shape == (num_nodes, num_classes), out.shape
    ref_m = gcn_forward_matched_ref(params, x, edge_index, num_nodes)
    ref_f = gcn_forward_ref(params, x, edge_index, num_nodes)
    assert jnp.allclose(out, ref_m, atol=2e-2, rtol=2e-2), "fused: mismatch vs matched ref"
    assert jnp.allclose(out, ref_f, atol=5e-2, rtol=5e-2), "fused: mismatch vs f32 ref"

    # ---- Test 2: larger graph, force the tiled per-layer fused kernel path ----
    num_nodes2 = 600
    in_features2 = 200
    hidden_size2 = 64
    num_classes2 = 7
    num_layers2 = 3
    num_edges2 = 2400

    k_x2, k_e2, k_p2 = jax.random.split(jax.random.PRNGKey(1), 3)
    x2 = jax.random.normal(k_x2, (num_nodes2, in_features2), jnp.float32)
    edge_index2 = jax.random.randint(k_e2, (2, num_edges2), 0, num_nodes2, jnp.int32)
    params2 = init_gcn_params(k_p2, in_features2, hidden_size2, num_classes2, num_layers2)

    out2 = gcn_forward(params2, x2, edge_index2, num_nodes=num_nodes2, mode="tiled")
    out2 = jax.block_until_ready(out2)
    assert out2.shape == (num_nodes2, num_classes2), out2.shape
    ref_m2 = gcn_forward_matched_ref(params2, x2, edge_index2, num_nodes2)
    ref_f2 = gcn_forward_ref(params2, x2, edge_index2, num_nodes2)
    assert jnp.allclose(out2, ref_m2, atol=2e-2, rtol=2e-2), "tiled: mismatch vs matched ref"
    assert jnp.allclose(out2, ref_f2, atol=1e-1, rtol=1e-1), "tiled: mismatch vs f32 ref"

    print("KERNEL_OK")
</pallas_src>

<mosaic_0001>
module attributes {stable_mosaic.version = 11 : i64} {
  func.func private @main(%arg0: i32) attributes {dimension_semantics = [#tpu.dimension_semantics<core_parallel>], iteration_bounds = array<i64: 2>, tpu.core_type = #tpu.core_type<sc_scalar_subcore>, window_params = []} {
    return
  }
}

module attributes {stable_mosaic.version = 11 : i64} {
  func.func private @main(%arg0: i32) attributes {dimension_semantics = [#tpu.dimension_semantics<core_parallel>], iteration_bounds = array<i64: 2>, tpu.core_type = #tpu.core_type<sc_scalar_subcore>, window_params = []} {
    return
  }
}

module attributes {stable_mosaic.version = 11 : i64} {
  func.func @_gcn_stack_kernel(%arg0: i32, %arg1: memref<128x128xbf16, #tpu.memory_space<vmem>>, %arg2: memref<128x128xbf16, #tpu.memory_space<vmem>>, %arg3: memref<2x128x128xbf16, #tpu.memory_space<vmem>>, %arg4: memref<2x1x128xf32, #tpu.memory_space<vmem>>, %arg5: memref<128x128xf32, #tpu.memory_space<vmem>>) attributes {dimension_semantics = [#tpu.dimension_semantics<arbitrary>], iteration_bounds = array<i64: 1>, scalar_prefetch = 0 : i64, scratch_operands = 0 : i64, tpu.core_type = #tpu.core_type<tc>, window_params = [{pipeline_mode = #tpu.pipeline_mode<synchronous>, transform_indices = @transform_0, window_bounds = array<i64: 128, 128>}, {pipeline_mode = #tpu.pipeline_mode<synchronous>, transform_indices = @transform_1, window_bounds = array<i64: 128, 128>}, {pipeline_mode = #tpu.pipeline_mode<synchronous>, transform_indices = @transform_2, window_bounds = array<i64: 2, 128, 128>}, {pipeline_mode = #tpu.pipeline_mode<synchronous>, transform_indices = @transform_3, window_bounds = array<i64: 2, 1, 128>}, {pipeline_mode = #tpu.pipeline_mode<synchronous>, transform_indices = @transform_4, window_bounds = array<i64: 128, 128>}]} {
    %c0 = arith.constant 0 : index
    %c0_0 = arith.constant 0 : index
    %0 = vector.load %arg1[%c0, %c0_0] : memref<128x128xbf16, #tpu.memory_space<vmem>>, vector<128x128xbf16>
    %c0_1 = arith.constant 0 : index
    %c0_2 = arith.constant 0 : index
    %1 = vector.load %arg2[%c0_1, %c0_2] : memref<128x128xbf16, #tpu.memory_space<vmem>>, vector<128x128xbf16>
    %cst = arith.constant dense<0.000000e+00> : vector<128x128xf32>
    %2 = tpu.matmul %0, %1, %cst {dimension_numbers = #tpu.dot_dimension_numbers<[1], [0], [0], [1], [0, 0, 1, 1], [], []>} : vector<128x128xbf16>, vector<128x128xbf16>, vector<128x128xf32> -> vector<128x128xf32>
    %3 = arith.truncf %2 : vector<128x128xf32> to vector<128x128xbf16>
    %c0_3 = arith.constant 0 : index
    %c0_4 = arith.constant 0 : index
    %c0_5 = arith.constant 0 : index
    %4 = vector.load %arg3[%c0_3, %c0_4, %c0_5] : memref<2x128x128xbf16, #tpu.memory_space<vmem>>, vector<1x128x128xbf16>
    %5 = vector.shape_cast %4 : vector<1x128x128xbf16> to vector<128x128xbf16>
    %cst_6 = arith.constant dense<0.000000e+00> : vector<128x128xf32>
    %6 = tpu.matmul %3, %5, %cst_6 {dimension_numbers = #tpu.dot_dimension_numbers<[1], [0], [0], [1], [0, 0, 1, 1], [], []>} : vector<128x128xbf16>, vector<128x128xbf16>, vector<128x128xf32> -> vector<128x128xf32>
    %c0_7 = arith.constant 0 : index
    %c0_8 = arith.constant 0 : index
    %c0_9 = arith.constant 0 : index
    %7 = vector.load %arg4[%c0_7, %c0_8, %c0_9] : memref<2x1x128xf32, #tpu.memory_space<vmem>>, vector<1x1x128xf32>
    %8 = vector.shape_cast %7 : vector<1x1x128xf32> to vector<1x128xf32>
    %9 = vector.broadcast %8 : vector<1x128xf32> to vector<128x128xf32>
    %10 = arith.addf %6, %9 : vector<128x128xf32>
    %cst_10 = arith.constant 0.000000e+00 : f32
    %11 = vector.broadcast %cst_10 : f32 to vector<128x128xf32>
    %12 = arith.maximumf %10, %11 : vector<128x128xf32>
    %13 = arith.truncf %12 : vector<128x128xf32> to vector<128x128xbf16>
    %cst_11 = arith.constant dense<0.000000e+00> : vector<128x128xf32>
    %14 = tpu.matmul %0, %13, %cst_11 {dimension_numbers = #tpu.dot_dimension_numbers<[1], [0], [0], [1], [0, 0, 1, 1], [], []>} : vector<128x128xbf16>, vector<128x128xbf16>, vector<128x128xf32> -> vector<128x128xf32>
    %15 = arith.truncf %14 : vector<128x128xf32> to vector<128x128xbf16>
    %c1 = arith.constant 1 : index
    %c0_12 = arith.constant 0 : index
    %c0_13 = arith.constant 0 : index
    %16 = vector.load %arg3[%c1, %c0_12, %c0_13] : memref<2x128x128xbf16, #tpu.memory_space<vmem>>, vector<1x128x128xbf16>
    %17 = vector.shape_cast %16 : vector<1x128x128xbf16> to vector<128x128xbf16>
    %cst_14 = arith.constant dense<0.000000e+00> : vector<128x128xf32>
    %18 = tpu.matmul %15, %17, %cst_14 {dimension_numbers = #tpu.dot_dimension_numbers<[1], [0], [0], [1], [0, 0, 1, 1], [], []>} : vector<128x128xbf16>, vector<128x128xbf16>, vector<128x128xf32> -> vector<128x128xf32>
    %c1_15 = arith.constant 1 : index
    %c0_16 = arith.constant 0 : index
    %c0_17 = arith.constant 0 : index
    %19 = vector.load %arg4[%c1_15, %c0_16, %c0_17] : memref<2x1x128xf32, #tpu.memory_space<vmem>>, vector<1x1x128xf32>
    %20 = vector.shape_cast %19 : vector<1x1x128xf32> to vector<1x128xf32>
    %21 = vector.broadcast %20 : vector<1x128xf32> to vector<128x128xf32>
    %22 = arith.addf %18, %21 : vector<128x128xf32>
    %cst_18 = arith.constant 0.000000e+00 : f32
    %23 = vector.broadcast %cst_18 : f32 to vector<128x128xf32>
    %24 = arith.maximumf %22, %23 : vector<128x128xf32>
    %c0_19 = arith.constant 0 : index
    %c0_20 = arith.constant 0 : index
    %25 = vector.load %arg5[%c0_19, %c0_20] : memref<128x128xf32, #tpu.memory_space<vmem>>, vector<128x128xf32>
    tpu.vector_store %arg5[%c0_19, %c0_20], %24 {strides = array<i32>} : memref<128x128xf32, #tpu.memory_space<vmem>>, vector<128x128xf32>,
    return
  }
  func.func @transform_0(%arg0: i32) -> (i32, i32) {
    %c0_i32 = arith.constant 0 : i32
    %c0_i32_0 = arith.constant 0 : i32
    %c0_i32_1 = arith.constant 0 : i32
    return %c0_i32, %c0_i32_0 : i32, i32
  }
  func.func @transform_1(%arg0: i32) -> (i32, i32) {
    %c0_i32 = arith.constant 0 : i32
    %c0_i32_0 = arith.constant 0 : i32
    %c0_i32_1 = arith.constant 0 : i32
    return %c0_i32, %c0_i32_0 : i32, i32
  }
  func.func @transform_2(%arg0: i32) -> (i32, i32, i32) {
    %c0_i32 = arith.constant 0 : i32
    %c0_i32_0 = arith.constant 0 : i32
    %c0_i32_1 = arith.constant 0 : i32
    %c0_i32_2 = arith.constant 0 : i32
    return %c0_i32, %c0_i32_0, %c0_i32_1 : i32, i32, i32
  }
  func.func @transform_3(%arg0: i32) -> (i32, i32, i32) {
    %c0_i32 = arith.constant 0 : i32
    %c0_i32_0 = arith.constant 0 : i32
    %c0_i32_1 = arith.constant 0 : i32
    %c0_i32_2 = arith.constant 0 : i32
    return %c0_i32, %c0_i32_0, %c0_i32_1 : i32, i32, i32
  }
  func.func @transform_4(%arg0: i32) -> (i32, i32) {
    %c0_i32 = arith.constant 0 : i32
    %c0_i32_0 = arith.constant 0 : i32
    %c0_i32_1 = arith.constant 0 : i32
    return %c0_i32, %c0_i32_0 : i32, i32
  }
}

</mosaic_0001>

<bundles_post_ra>
// kernel: gcn_forward.1
= control target key start
LH: loop header
LB: loop body
LE: loop exit
PB: predicated region body
PF: predicated region fallthrough
CT: control target
= control target key end

     0   :  { %s1232_s1 = inlined_call_operand.vmem [shape: bf16[128,128], index: 1, kind: input, shape index: {}]   ;;  %s1233_s0 = inlined_call_operand.vmem [shape: bf16[128,128], index: 0, kind: input, shape index: {}]   ;;  %s1234_s2 = inlined_call_operand.vmem [shape: bf16[2,128,128], index: 2, kind: input, shape index: {}]   ;;  %s1235_s3 = inlined_call_operand.vmem [shape: f32[2,1,128], index: 3, kind: input, shape index: {}]   ;;  %s1236_s4 = inlined_call_operand.vmem [shape: f32[128,128], index: 4, kind: output, shape index: {}]  }
   0x1   :  { %v997_v0 = vld [vmem:[%s1232_s1] sm:$0xff]   ;;  %v998_v1 = vld [vmem:[%s1232_s1 + $0x8] sm:$0xff]   ;;  %v999_v2 = vld [vmem:[%s1232_s1 + $0x10] sm:$0xff]  }
   0x2   :  { %869 = vmatprep.subr.bf16.mxu0 %v997_v0  ;;  %v1000_v3 = vld [vmem:[%s1232_s1 + $0x18] sm:$0xff]   ;;  %v1005_v4 = vld [vmem:[%s1233_s0] sm:$0xff]   ;;  %v1002_v6 = vld [vmem:[%s1232_s1 + $0x28] sm:$0xff]  }
   0x3   :  { %870 = vmatpush3.bf16.msra.mxu0 %v997_v0  ;;  %885 = vmatprep.mubr.bf16.mxu0 %v1005_v4  ;;  %v1001_v5 = vld [vmem:[%s1232_s1 + $0x20] sm:$0xff]   ;;  %v1014_v8 = vld [vmem:[%s1234_s2 + $0x8] sm:$0xff]   ;;  %v1003_v9 = vld [vmem:[%s1232_s1 + $0x30] sm:$0xff]  }
   0x4   :  { %871 = vmatprep.subr.bf16.mxu0 %v998_v1  ;;  %v1013_v7 = vld [vmem:[%s1234_s2] sm:$0xff]   ;;  %v1015_v10 = vld [vmem:[%s1234_s2 + $0x10] sm:$0xff]   ;;  %v1004_v11 = vld [vmem:[%s1232_s1 + $0x38] sm:$0xff]  }
   0x5   :  { %901 = vmatprep.subr.bf16.mxu1 %v1013_v7  ;;  %v1016_v12 = vld [vmem:[%s1234_s2 + $0x18] sm:$0xff]   ;;  %v1017_v13 = vld [vmem:[%s1234_s2 + $0x20] sm:$0xff]   ;;  %v1099_v14 = vld [vmem:[%s1233_s0 + $0x8] sm:$0xff]  }
   0x6   :  { %902 = vmatpush3.bf16.msra.mxu1 %v1013_v7  ;;  %v1104_v15 = vld [vmem:[%s1233_s0 + $0x10] sm:$0xff]   ;;  %v1018_v16 = vld [vmem:[%s1234_s2 + $0x28] sm:$0xff]   ;;  %v1117_v18 = vld [vmem:[%s1233_s0 + $0x18] sm:$0xff]  }
   0x7   :  { %872 = vmatpush3.bf16.msra.mxu0 %v998_v1  ;;  %903 = vmatprep.subr.bf16.mxu1 %v1014_v8  ;;  %v1019_v17 = vld [vmem:[%s1234_s2 + $0x30] sm:$0xff]   ;;  %v1122_v19 = vld [vmem:[%s1233_s0 + $0x20] sm:$0xff]   ;;  %v1129_v20 = vld [vmem:[%s1233_s0 + $0x28] sm:$0xff]  }
   0x8   :  { %873 = vmatprep.subr.bf16.mxu0 %v999_v2  ;;  %v1134_v21 = vld [vmem:[%s1233_s0 + $0x30] sm:$0xff]   ;;  %v1141_v22 = vld [vmem:[%s1233_s0 + $0x38] sm:$0xff]   ;;  %v1021_v48 = vld [vmem:[%s1234_s2 + $0x40] sm:$0xff]  }
   0x9   :  { %v1020_v23 = vld [vmem:[%s1234_s2 + $0x38] sm:$0xff]   ;;  %v1022_v49 = vld [vmem:[%s1234_s2 + $0x48] sm:$0xff]   ;;  %v1023_v50 = vld [vmem:[%s1234_s2 + $0x50] sm:$0xff]  }
   0xa   :  { %904 = vmatpush3.bf16.msra.mxu1 %v1014_v8  ;;  %v1024_v51 = vld [vmem:[%s1234_s2 + $0x58] sm:$0xff]   ;;  %v1025_v52 = vld [vmem:[%s1234_s2 + $0x60] sm:$0xff]   ;;  %v1026_v53 = vld [vmem:[%s1234_s2 + $0x68] sm:$0xff]  }
   0xb   :  { %874 = vmatpush3.bf16.msra.mxu0 %v999_v2  ;;  %905 = vmatprep.subr.bf16.mxu1 %v1015_v10  ;;  %v1027_v54 = vld [vmem:[%s1234_s2 + $0x70] sm:$0xff]   ;;  %v770_v55 = vld [vmem:[%s1235_s3] ss:$0 sm:$0xff] }
   0xc   :  { %875 = vmatprep.subr.bf16.mxu0 %v1000_v3 }
   0xe   :  { %906 = vmatpush3.bf16.msra.mxu1 %v1015_v10 }
   0xf   :  { %876 = vmatpush3.bf16.msra.mxu0 %v1000_v3  ;;  %907 = vmatprep.subr.bf16.mxu1 %v1016_v12 }
  0x10   :  { %877 = vmatprep.subr.bf16.mxu0 %v1001_v5 }
  0x12   :  { %908 = vmatpush3.bf16.msra.mxu1 %v1016_v12 }
  0x13   :  { %878 = vmatpush3.bf16.msra.mxu0 %v1001_v5  ;;  %909 = vmatprep.subr.bf16.mxu1 %v1017_v13 }
  0x14   :  { %879 = vmatprep.subr.bf16.mxu0 %v1002_v6 }
  0x16   :  { %910 = vmatpush3.bf16.msra.mxu1 %v1017_v13 }
  0x17   :  { %880 = vmatpush3.bf16.msra.mxu0 %v1002_v6  ;;  %911 = vmatprep.subr.bf16.mxu1 %v1018_v16 }
  0x18   :  { %881 = vmatprep.subr.bf16.mxu0 %v1003_v9 }
  0x1a   :  { %912 = vmatpush3.bf16.msra.mxu1 %v1018_v16 }
  0x1b   :  { %882 = vmatpush3.bf16.msra.mxu0 %v1003_v9  ;;  %913 = vmatprep.subr.bf16.mxu1 %v1019_v17 }
  0x1c   :  { %883 = vmatprep.subr.bf16.mxu0 %v1004_v11 }
  0x1e   :  { %914 = vmatpush3.bf16.msra.mxu1 %v1019_v17 }
  0x1f   :  { %884 = vmatpush3.bf16.msra.mxu0 %v1004_v11  ;;  %915 = vmatprep.subr.bf16.mxu1 %v1020_v23 }
  0x22   :  { %886 = vmatmul.mubr.bf16.vlgmr.msra.gmra.mrb[0].mxu0 %v1099_v14  ;;  %916 = vmatpush3.bf16.msra.mxu1 %v1020_v23 }
  0x23   :  { %889 = vmatprep.mubr.bf16.mxu0 %v1104_v15  ;;  %965 = vmatprep.subr.bf16.mxu1 %v1021_v48 }
  0x2a   :  { %890 = vmatmul.mubr.bf16.gmra.mrb[4].mxu0 %v1117_v18 }
  0x2b   :  { %893 = vmatprep.mubr.bf16.mxu0 %v1122_v19 }
  0x32   :  { %894 = vmatmul.mubr.bf16.gmra.mrb[8].mxu0 %v1129_v20 }
  0x33   :  { %897 = vmatprep.mubr.bf16.mxu0 %v1134_v21 }
  0x3a   :  { %898 = vmatmul.mubr.bf16.gmra.mrb[12].mxu0 %v1141_v22 }
  0x3b   :  { %949 = vmatprep.mubr.bf16.mxu0 %v1005_v4 }
  0xf5   :  { %v887_v24 = vpop.f32.mrb[0].mxu0 }
  0xf6   :  { %v180_v25 = vpop.f32.mrb[1].mxu0 }
  0xf7   :  { %v888_v26 = vpop.f32.mrb[2].mxu0 }
  0xf8   :  { %v244_v27 = vpack.c.bf16 %v888_v26, %v887_v24  ;;  %v183_v28 = vpop.f32.mrb[3].mxu0 }
  0xf9   :  { %v243_v29 = vpack.c.bf16 %v183_v28, %v180_v25 }
  0xfb   :  { %917 = vmatprep.mubr.bf16.mxu1 %v243_v29 }
  0xfc   :  { %918 = vmatmul.mubr.bf16.vlgmr.msra.gmra.mrb[0].mxu1 %v244_v27 }
  0xfd   :  { %v891_v30 = vpop.f32.mrb[4].mxu0  ;;  %966 = vmatpush3.bf16.msra.mxu1 %v1021_v48 }
  0xfe   :  { %v196_v31 = vpop.f32.mrb[5].mxu0  ;;  %967 = vmatprep.subr.bf16.mxu1 %v1022_v49 }
  0xff   :  { %v892_v32 = vpop.f32.mrb[6].mxu0 }
 0x100   :  { %v246_v33 = vpack.c.bf16 %v892_v32, %v891_v30  ;;  %v199_v34 = vpop.f32.mrb[7].mxu0 }
 0x101   :  { %v245_v35 = vpack.c.bf16 %v199_v34, %v196_v31  ;;  %968 = vmatpush3.bf16.msra.mxu1 %v1022_v49 }
 0x102   :  { %969 = vmatprep.subr.bf16.mxu1 %v1023_v50 }
 0x103   :  { %921 = vmatprep.mubr.bf16.mxu1 %v245_v35 }
 0x104   :  { %922 = vmatmul.mubr.bf16.gmra.mrb[4].mxu1 %v246_v33 }
 0x105   :  { %v895_v36 = vpop.f32.mrb[8].mxu0  ;;  %970 = vmatpush3.bf16.msra.mxu1 %v1023_v50 }
 0x106   :  { %v212_v37 = vpop.f32.mrb[9].mxu0  ;;  %971 = vmatprep.subr.bf16.mxu1 %v1024_v51 }
 0x107   :  { %v896_v38 = vpop.f32.mrb[10].mxu0 }
 0x108   :  { %v248_v39 = vpack.c.bf16 %v896_v38, %v895_v36  ;;  %v215_v40 = vpop.f32.mrb[11].mxu0 }
 0x109   :  { %v247_v41 = vpack.c.bf16 %v215_v40, %v212_v37  ;;  %972 = vmatpush3.bf16.msra.mxu1 %v1024_v51 }
 0x10a   :  { %973 = vmatprep.subr.bf16.mxu1 %v1025_v52 }
 0x10b   :  { %925 = vmatprep.mubr.bf16.mxu1 %v247_v41 }
 0x10c   :  { %926 = vmatmul.mubr.bf16.gmra.mrb[8].mxu1 %v248_v39 }
 0x10d   :  { %v899_v42 = vpop.f32.mrb[12].mxu0  ;;  %974 = vmatpush3.bf16.msra.mxu1 %v1025_v52 }
 0x10e   :  { %v228_v43 = vpop.f32.mrb[13].mxu0  ;;  %975 = vmatprep.subr.bf16.mxu1 %v1026_v53 }
 0x10f   :  { %v900_v44 = vpop.f32.mrb[14].mxu0 }
 0x110   :  { %v250_v45 = vpack.c.bf16 %v900_v44, %v899_v42  ;;  %v231_v46 = vpop.f32.mrb[15].mxu0 }
 0x111   :  { %v249_v47 = vpack.c.bf16 %v231_v46, %v228_v43  ;;  %976 = vmatpush3.bf16.msra.mxu1 %v1026_v53 }
 0x112   :  { %977 = vmatprep.subr.bf16.mxu1 %v1027_v54 }
 0x113   :  { %929 = vmatprep.mubr.bf16.mxu1 %v249_v47 }
 0x114   :  { %930 = vmatmul.mubr.bf16.gmra.mrb[12].mxu1 %v250_v45 }
 0x115   :  { %978 = vmatpush3.bf16.msra.mxu1 %v1027_v54 }
 0x1cf   :  { %v919_v56 = vpop.f32.mrb[0].mxu1 }
 0x1d0   :  { %v365_v57 = vadd.f32 %v919_v56, %v770_v55  ;;  %v356_v58 = vpop.f32.mrb[1].mxu1 }
 0x1d1   :  { %v357_v59 = vadd.f32 %v770_v55, %v356_v58  ;;  %v920_v60 = vpop.f32.mrb[2].mxu1 }
 0x1d2   :  { %v368_v61 = vadd.f32 %v920_v60, %v770_v55  ;;  %v359_v62 = vpop.f32.mrb[3].mxu1  ;;  %v421_v0 = vmax.f32 %v365_v57, 0.0 }
 0x1d3   :  { %v360_v63 = vadd.f32 %v770_v55, %v359_v62  ;;  %v419_v2 = vmax.f32 %v357_v59, 0.0 }
 0x1d4   :  { %v422_v1 = vmax.f32 %v368_v61, 0.0 }
 0x1d5   :  { %v420_v3 = vmax.f32 %v360_v63, 0.0 }
 0x1d6   :  { %v436_v4 = vpack.c.bf16 %v422_v1, %v421_v0 }
 0x1d7   :  { %v435_v5 = vpack.c.bf16 %v420_v3, %v419_v2  ;;  %v923_v6 = vpop.f32.mrb[4].mxu1 }
 0x1d8   :  { %v381_v7 = vadd.f32 %v923_v6, %v770_v55  ;;  %v372_v8 = vpop.f32.mrb[5].mxu1 }
 0x1d9   :  { %v373_v9 = vadd.f32 %v770_v55, %v372_v8  ;;  %v924_v10 = vpop.f32.mrb[6].mxu1  ;;  %933 = vmatprep.subr.bf16.mxu0 %v435_v5 }
 0x1da   :  { %v384_v11 = vadd.f32 %v924_v10, %v770_v55  ;;  %v375_v12 = vpop.f32.mrb[7].mxu1  ;;  %934 = vmatpush3.bf16.msra.mxu0 %v435_v5  ;;  %v425_v16 = vmax.f32 %v381_v7, 0.0 }
 0x1db   :  { %v376_v13 = vadd.f32 %v770_v55, %v375_v12  ;;  %935 = vmatprep.subr.bf16.mxu0 %v436_v4  ;;  %v423_v23 = vmax.f32 %v373_v9, 0.0  ;;  %v796_v9 = vld [vmem:[%s1235_s3 + $0x1] ss:$0 sm:$0xff] }
 0x1dc   :  { %v426_v17 = vmax.f32 %v384_v11, 0.0 }
 0x1dd   :  { %v424_v24 = vmax.f32 %v376_v13, 0.0 }
 0x1de   :  { %v438_v25 = vpack.c.bf16 %v426_v17, %v425_v16  ;;  %936 = vmatpush3.bf16.msra.mxu0 %v436_v4 }
 0x1df   :  { %v437_v26 = vpack.c.bf16 %v424_v24, %v423_v23  ;;  %v927_v27 = vpop.f32.mrb[8].mxu1 }
 0x1e0   :  { %v397_v28 = vadd.f32 %v927_v27, %v770_v55  ;;  %v388_v29 = vpop.f32.mrb[9].mxu1 }
 0x1e1   :  { %v389_v30 = vadd.f32 %v770_v55, %v388_v29  ;;  %v928_v31 = vpop.f32.mrb[10].mxu1  ;;  %937 = vmatprep.subr.bf16.mxu0 %v437_v26 }
 0x1e2   :  { %v400_v32 = vadd.f32 %v928_v31, %v770_v55  ;;  %v391_v33 = vpop.f32.mrb[11].mxu1  ;;  %938 = vmatpush3.bf16.msra.mxu0 %v437_v26  ;;  %v429_v35 = vmax.f32 %v397_v28, 0.0 }
 0x1e3   :  { %v392_v34 = vadd.f32 %v770_v55, %v391_v33  ;;  %939 = vmatprep.subr.bf16.mxu0 %v438_v25  ;;  %v427_v37 = vmax.f32 %v389_v30, 0.0 }
 0x1e4   :  { %v430_v36 = vmax.f32 %v400_v32, 0.0 }
 0x1e5   :  { %v428_v38 = vmax.f32 %v392_v34, 0.0 }
 0x1e6   :  { %v440_v39 = vpack.c.bf16 %v430_v36, %v429_v35  ;;  %940 = vmatpush3.bf16.msra.mxu0 %v438_v25 }
 0x1e7   :  { %v439_v40 = vpack.c.bf16 %v428_v38, %v427_v37  ;;  %v931_v41 = vpop.f32.mrb[12].mxu1 }
 0x1e8   :  { %v413_v42 = vadd.f32 %v931_v41, %v770_v55  ;;  %v404_v43 = vpop.f32.mrb[13].mxu1 }
 0x1e9   :  { %v405_v44 = vadd.f32 %v770_v55, %v404_v43  ;;  %v932_v45 = vpop.f32.mrb[14].mxu1  ;;  %941 = vmatprep.subr.bf16.mxu0 %v439_v40 }
 0x1ea   :  { %v416_v46 = vadd.f32 %v932_v45, %v770_v55  ;;  %v407_v47 = vpop.f32.mrb[15].mxu1  ;;  %942 = vmatpush3.bf16.msra.mxu0 %v439_v40  ;;  %v433_v49 = vmax.f32 %v413_v42, 0.0 }
 0x1eb   :  { %v408_v48 = vadd.f32 %v770_v55, %v407_v47  ;;  %943 = vmatprep.subr.bf16.mxu0 %v440_v39  ;;  %v431_v51 = vmax.f32 %v405_v44, 0.0  ;;  %v1028_v55 = vld [vmem:[%s1234_s2 + $0x78] sm:$0xff]  }
 0x1ec   :  { %v434_v50 = vmax.f32 %v416_v46, 0.0  ;;  %979 = vmatprep.subr.bf16.mxu1 %v1028_v55 }
 0x1ed   :  { %v432_v52 = vmax.f32 %v408_v48, 0.0  ;;  %980 = vmatpush3.bf16.msra.mxu1 %v1028_v55 }
 0x1ee   :  { %v442_v53 = vpack.c.bf16 %v434_v50, %v433_v49  ;;  %944 = vmatpush3.bf16.msra.mxu0 %v440_v39 }
 0x1ef   :  { %v441_v54 = vpack.c.bf16 %v432_v52, %v431_v51 }
 0x1f1   :  { %945 = vmatprep.subr.bf16.mxu0 %v441_v54 }
 0x1f2   :  { %946 = vmatpush3.bf16.msra.mxu0 %v441_v54 }
 0x1f3   :  { %947 = vmatprep.subr.bf16.mxu0 %v442_v53 }
 0x1f6   :  { %948 = vmatpush3.bf16.msra.mxu0 %v442_v53 }
 0x1f9   :  { %950 = vmatmul.mubr.bf16.vlgmr.msra.gmra.mrb[16].mxu0 %v1099_v14 }
 0x1fa   :  { %953 = vmatprep.mubr.bf16.mxu0 %v1104_v15 }
 0x201   :  { %954 = vmatmul.mubr.bf16.gmra.mrb[20].mxu0 %v1117_v18 }
 0x202   :  { %957 = vmatprep.mubr.bf16.mxu0 %v1122_v19 }
 0x209   :  { %958 = vmatmul.mubr.bf16.gmra.mrb[24].mxu0 %v1129_v20 }
 0x20a   :  { %961 = vmatprep.mubr.bf16.mxu0 %v1134_v21 }
 0x211   :  { %962 = vmatmul.mubr.bf16.gmra.mrb[28].mxu0 %v1141_v22 }
 0x2cc   :  { %v951_v56 = vpop.f32.mrb[16].mxu0 }
 0x2cd   :  { %v477_v14 = vpop.f32.mrb[17].mxu0 }
 0x2ce   :  { %v952_v57 = vpop.f32.mrb[18].mxu0 }
 0x2cf   :  { %v541_v15 = vpack.c.bf16 %v952_v57, %v951_v56  ;;  %v480_v58 = vpop.f32.mrb[19].mxu0 }
 0x2d0   :  { %v540_v18 = vpack.c.bf16 %v480_v58, %v477_v14 }
 0x2d2   :  { %981 = vmatprep.mubr.bf16.mxu1 %v540_v18 }
 0x2d3   :  { %982 = vmatmul.mubr.bf16.vlgmr.msra.gmra.mrb[16].mxu1 %v541_v15 }
 0x2d4   :  { %v955_v19 = vpop.f32.mrb[20].mxu0 }
 0x2d5   :  { %v493_v20 = vpop.f32.mrb[21].mxu0 }
 0x2d6   :  { %v956_v59 = vpop.f32.mrb[22].mxu0 }
 0x2d7   :  { %v543_v21 = vpack.c.bf16 %v956_v59, %v955_v19  ;;  %v496_v60 = vpop.f32.mrb[23].mxu0 }
 0x2d8   :  { %v542_v22 = vpack.c.bf16 %v496_v60, %v493_v20 }
 0x2da   :  { %985 = vmatprep.mubr.bf16.mxu1 %v542_v22 }
 0x2db   :  { %986 = vmatmul.mubr.bf16.gmra.mrb[20].mxu1 %v543_v21 }
 0x2dc   :  { %v959_v61 = vpop.f32.mrb[24].mxu0 }
 0x2dd   :  { %v509_v62 = vpop.f32.mrb[25].mxu0 }
 0x2de   :  { %v960_v63 = vpop.f32.mrb[26].mxu0 }
 0x2df   :  { %v545_v0 = vpack.c.bf16 %v960_v63, %v959_v61  ;;  %v512_v1 = vpop.f32.mrb[27].mxu0 }
 0x2e0   :  { %v544_v2 = vpack.c.bf16 %v512_v1, %v509_v62 }
 0x2e2   :  { %989 = vmatprep.mubr.bf16.mxu1 %v544_v2 }
 0x2e3   :  { %990 = vmatmul.mubr.bf16.gmra.mrb[24].mxu1 %v545_v0 }
 0x2e4   :  { %v963_v3 = vpop.f32.mrb[28].mxu0 }
 0x2e5   :  { %v525_v4 = vpop.f32.mrb[29].mxu0 }
 0x2e6   :  { %v964_v5 = vpop.f32.mrb[30].mxu0 }
 0x2e7   :  { %v547_v6 = vpack.c.bf16 %v964_v5, %v963_v3  ;;  %v528_v7 = vpop.f32.mrb[31].mxu0 }
 0x2e8   :  { %v546_v8 = vpack.c.bf16 %v528_v7, %v525_v4 }
 0x2ea   :  { %993 = vmatprep.mubr.bf16.mxu1 %v546_v8 }
 0x2eb   :  { %994 = vmatmul.mubr.bf16.gmra.mrb[28].mxu1 %v547_v6 }
 0x3a6   :  { %v983_v10 = vpop.f32.mrb[16].mxu1 }
 0x3a7   :  { %v664_v11 = vadd.f32 %v983_v10, %v796_v9  ;;  %v655_v12 = vpop.f32.mrb[17].mxu1 }
 0x3a8   :  { %v656_v13 = vadd.f32 %v796_v9, %v655_v12  ;;  %v984_v16 = vpop.f32.mrb[18].mxu1 }
 0x3a9   :  { %v720_v17 = vmax.f32 %v664_v11, 0.0  ;;  %v667_v23 = vadd.f32 %v984_v16, %v796_v9  ;;  %v658_v24 = vpop.f32.mrb[19].mxu1 }
 0x3aa   :  { %v718_v25 = vmax.f32 %v656_v13, 0.0  ;;  %v659_v26 = vadd.f32 %v796_v9, %v658_v24 }
 0x3ab   :  { %736 = vst [vmem:[%s1236_s4 + $0x10] sm:$0xff] %v720_v17  ;;  %v721_v27 = vmax.f32 %v667_v23, 0.0 }
 0x3ac   :  { %734 = vst [vmem:[%s1236_s4] sm:$0xff] %v718_v25  ;;  %v719_v28 = vmax.f32 %v659_v26, 0.0 }
 0x3ad   :  { %737 = vst [vmem:[%s1236_s4 + $0x18] sm:$0xff] %v721_v27 }
 0x3ae   :  { %735 = vst [vmem:[%s1236_s4 + $0x8] sm:$0xff] %v719_v28  ;;  %v987_v29 = vpop.f32.mrb[20].mxu1 }
 0x3af   :  { %v680_v30 = vadd.f32 %v987_v29, %v796_v9  ;;  %v671_v31 = vpop.f32.mrb[21].mxu1 }
 0x3b0   :  { %v672_v32 = vadd.f32 %v796_v9, %v671_v31  ;;  %v988_v33 = vpop.f32.mrb[22].mxu1 }
 0x3b1   :  { %v724_v34 = vmax.f32 %v680_v30, 0.0  ;;  %v683_v35 = vadd.f32 %v988_v33, %v796_v9  ;;  %v674_v36 = vpop.f32.mrb[23].mxu1 }
 0x3b2   :  { %v722_v37 = vmax.f32 %v672_v32, 0.0  ;;  %v675_v38 = vadd.f32 %v796_v9, %v674_v36 }
 0x3b3   :  { %740 = vst [vmem:[%s1236_s4 + $0x30] sm:$0xff] %v724_v34  ;;  %v725_v39 = vmax.f32 %v683_v35, 0.0 }
 0x3b4   :  { %738 = vst [vmem:[%s1236_s4 + $0x20] sm:$0xff] %v722_v37  ;;  %v723_v40 = vmax.f32 %v675_v38, 0.0 }
 0x3b5   :  { %741 = vst [vmem:[%s1236_s4 + $0x38] sm:$0xff] %v725_v39 }
 0x3b6   :  { %739 = vst [vmem:[%s1236_s4 + $0x28] sm:$0xff] %v723_v40  ;;  %v991_v41 = vpop.f32.mrb[24].mxu1 }
 0x3b7   :  { %v696_v42 = vadd.f32 %v991_v41, %v796_v9  ;;  %v687_v43 = vpop.f32.mrb[25].mxu1 }
 0x3b8   :  { %v688_v44 = vadd.f32 %v796_v9, %v687_v43  ;;  %v992_v45 = vpop.f32.mrb[26].mxu1 }
 0x3b9   :  { %v728_v46 = vmax.f32 %v696_v42, 0.0  ;;  %v699_v47 = vadd.f32 %v992_v45, %v796_v9  ;;  %v690_v48 = vpop.f32.mrb[27].mxu1 }
 0x3ba   :  { %v726_v49 = vmax.f32 %v688_v44, 0.0  ;;  %v691_v50 = vadd.f32 %v796_v9, %v690_v48 }
 0x3bb   :  { %744 = vst [vmem:[%s1236_s4 + $0x50] sm:$0xff] %v728_v46  ;;  %v729_v51 = vmax.f32 %v699_v47, 0.0 }
 0x3bc   :  { %742 = vst [vmem:[%s1236_s4 + $0x40] sm:$0xff] %v726_v49  ;;  %v727_v52 = vmax.f32 %v691_v50, 0.0 }
 0x3bd   :  { %745 = vst [vmem:[%s1236_s4 + $0x58] sm:$0xff] %v729_v51 }
 0x3be   :  { %743 = vst [vmem:[%s1236_s4 + $0x48] sm:$0xff] %v727_v52  ;;  %v995_v53 = vpop.f32.mrb[28].mxu1 }
 0x3bf   :  { %v712_v54 = vadd.f32 %v995_v53, %v796_v9  ;;  %v703_v55 = vpop.f32.mrb[29].mxu1 }
 0x3c0   :  { %v704_v56 = vadd.f32 %v796_v9, %v703_v55  ;;  %v996_v14 = vpop.f32.mrb[30].mxu1 }
 0x3c1   :  { %v732_v57 = vmax.f32 %v712_v54, 0.0  ;;  %v715_v15 = vadd.f32 %v996_v14, %v796_v9  ;;  %v706_v58 = vpop.f32.mrb[31].mxu1 }
 0x3c2   :  { %v730_v18 = vmax.f32 %v704_v56, 0.0  ;;  %v707_v19 = vadd.f32 %v796_v9, %v706_v58 }
 0x3c3   :  { %748 = vst [vmem:[%s1236_s4 + $0x70] sm:$0xff] %v732_v57  ;;  %v733_v20 = vmax.f32 %v715_v15, 0.0 }
 0x3c4   :  { %746 = vst [vmem:[%s1236_s4 + $0x60] sm:$0xff] %v730_v18  ;;  %v731_v59 = vmax.f32 %v707_v19, 0.0 }
 0x3c5   :  { %749 = vst [vmem:[%s1236_s4 + $0x78] sm:$0xff] %v733_v20 }
 0x3c6   :  { %747 = vst [vmem:[%s1236_s4 + $0x68] sm:$0xff] %v731_v59 }

</bundles_post_ra>
